<compile_context>
chip_gen: v5e
topology: v5e:2x2
jax: 0.10.0
libtpu: 0.0.40
codegen_flags: <defaults>
</compile_context>

<pallas_src>
import math

import jax
import jax.numpy as jnp
from jax.experimental import pallas as pl
from jax.experimental.pallas import tpu as pltpu


# Double-buffered (input + output) tile budget and scoped-VMEM limit.
# 24 MiB tiles + 48 MiB limit fit comfortably on v5e/v6e (128 MiB physical
# VMEM) and v7x (64 MiB physical VMEM).
_VMEM_TILE_BUDGET_BYTES = 24 * 1024 * 1024
_VMEM_LIMIT_BYTES = 48 * 1024 * 1024


def _init_weight(maxlen: int, hidden_size: int) -> jnp.ndarray:
    """Deterministic sinusoidal table, same formula as the PyTorch module."""
    evens = jnp.arange(0, hidden_size, 2)
    odds = jnp.arange(1, hidden_size, 2)
    even_freq = 10000.0 ** (evens.astype(jnp.float32) / hidden_size)
    odd_freq = 10000.0 ** (odds.astype(jnp.float32) / hidden_size)
    pos = jnp.arange(0, maxlen).astype(jnp.float32)[:, None]
    w = jnp.zeros((maxlen, hidden_size), jnp.float32)
    w = w.at[:, evens].set(jnp.sin(pos / even_freq[None, :]))
    w = w.at[:, odds].set(jnp.cos(pos / odd_freq[None, :]))
    return w


def _pos_emb_dim1_kernel(w_ref, o_ref):
    # w_ref: (1, tT*H) lane-dense slab of weight rows [t*tT, (t+1)*tT)
    # o_ref: (B, tT*H)  — the batch repeat is a sublane broadcast; the store
    # stream is full-lane (minor dim is a large multiple of 128 when tiled).
    o_ref[...] = jnp.broadcast_to(w_ref[...], o_ref.shape).astype(o_ref.dtype)


def _pos_emb_dim0_kernel(w_ref, o_ref):
    # w_ref: (tT, H); o_ref: (tT, B, H) written directly in the dim=0 layout,
    # so the wrapper never pays a second full-tensor transpose pass over HBM.
    o_ref[...] = jnp.broadcast_to(
        w_ref[...][:, None, :], o_ref.shape
    ).astype(o_ref.dtype)


def _choose_t_tile(T, B, H, in_itemsize, out_itemsize, unit):
    """Largest T-tile (multiple of `unit`) whose double-buffered input+output
    tiles fit the VMEM budget; collapses to a single grid step when it all fits."""
    per_row = 2 * (H * in_itemsize + B * H * out_itemsize)  # double-buffered
    max_rows = max(unit, _VMEM_TILE_BUDGET_BYTES // per_row)
    if max_rows >= T:
        return T
    return max(unit, (max_rows // unit) * unit)


def positional_embedding(X: jnp.ndarray, weight: jnp.ndarray, dim: int = 1,
                         out_dtype=None) -> jnp.ndarray:
    """Pallas equivalent of PositionalEmbedding.forward.

    X   : rank-2 tensor (only its shape is used)
    dim : which axis of X is the time dimension (default 1)
    out_dtype : optional narrower output dtype (e.g. bf16) to halve bytes
                written; defaults to weight.dtype to match the module.
    """
    assert X.ndim == 2
    shape = list(X.shape)
    T = int(shape.pop(dim))
    B = int(shape[0])
    maxlen, H = weight.shape
    assert T <= maxlen
    out_dtype = weight.dtype if out_dtype is None else jnp.dtype(out_dtype)

    in_itemsize = jnp.dtype(weight.dtype).itemsize
    out_itemsize = jnp.dtype(out_dtype).itemsize

    cost = pl.CostEstimate(
        flops=0,
        transcendentals=0,
        bytes_accessed=T * H * in_itemsize + B * T * H * out_itemsize,
    )
    cparams = pltpu.CompilerParams(
        # T-tile axis is embarrassingly parallel -> shards across TCs (v7x).
        dimension_semantics=("parallel",),
        vmem_limit_bytes=_VMEM_LIMIT_BYTES,
    )

    if dim == 0:
        # Emit the (T, B, H) layout directly from the kernel.
        tT = _choose_t_tile(T, B, H, in_itemsize, out_itemsize, unit=8)
        w_rows = weight[:T]  # tiny slice; makes full-extent blocks legal
        return pl.pallas_call(
            _pos_emb_dim0_kernel,
            out_shape=jax.ShapeDtypeStruct((T, B, H), out_dtype),
            grid=(pl.cdiv(T, tT),),
            in_specs=[pl.BlockSpec((tT, H), lambda t: (t, 0))],
            out_specs=pl.BlockSpec((tT, B, H), lambda t: (t, 0, 0)),
            compiler_params=cparams,
            cost_estimate=cost,
        )(w_rows)

    # dim == 1: lane-dense output.  Produce (B, T*H) so every store is a
    # full-width vst, then reshape back (free, row-major contiguous).
    # When tiling T, tT*H must stay a multiple of 128.
    unit = 128 // math.gcd(H, 128)
    tT = _choose_t_tile(T, B, H, in_itemsize, out_itemsize, unit=unit)
    w_slab = weight[:T].reshape(1, T * H)  # contiguous rows -> free flatten
    emb_flat = pl.pallas_call(
        _pos_emb_dim1_kernel,
        out_shape=jax.ShapeDtypeStruct((B, T * H), out_dtype),
        grid=(pl.cdiv(T, tT),),
        in_specs=[pl.BlockSpec((1, tT * H), lambda t: (0, t))],
        out_specs=pl.BlockSpec((B, tT * H), lambda t: (0, t)),
        compiler_params=cparams,
        cost_estimate=cost,
    )(w_slab)
    return emb_flat.reshape(B, T, H)


if __name__ == "__main__":
    maxlen = 64
    hidden_size = 32
    B, T = 2, 8

    weight = _init_weight(maxlen, hidden_size)

    key = jax.random.PRNGKey(0)
    # rank-2 input; only its shape matters for the forward pass
    X = jax.random.normal(key, (B, T), dtype=jnp.float32)

    out = jax.block_until_ready(positional_embedding(X, weight, dim=1))

    # reference check (pure JAX)
    ref = jnp.broadcast_to(weight[:T][None, :, :], (B, T, hidden_size))
    assert out.shape == (B, T, hidden_size)
    assert jnp.allclose(out, ref, atol=1e-6), "mismatch vs reference (dim=1)"

    # dim=0 path: X' of shape (T, B) -> output (T, B, H), written directly
    X0 = jnp.transpose(X)
    out0 = jax.block_until_ready(positional_embedding(X0, weight, dim=0))
    ref0 = jnp.transpose(ref, (1, 0, 2))
    assert out0.shape == (T, B, hidden_size)
    assert jnp.allclose(out0, ref0, atol=1e-6), "mismatch vs reference (dim=0)"

    print("KERNEL_OK")
</pallas_src>

<mosaic_0001>
module attributes {stable_mosaic.version = 11 : i64} {
  func.func @_pos_emb_dim1_kernel(%arg0: i32, %arg1: memref<1x256xf32, #tpu.memory_space<vmem>>, %arg2: memref<2x256xf32, #tpu.memory_space<vmem>>) attributes {dimension_semantics = [#tpu.dimension_semantics<parallel>], iteration_bounds = array<i64: 1>, scalar_prefetch = 0 : i64, scratch_operands = 0 : i64, tpu.core_type = #tpu.core_type<tc>, window_params = [{transform_indices = @transform_0, window_bounds = array<i64: 1, 256>}, {transform_indices = @transform_1, window_bounds = array<i64: 2, 256>}]} {
    %c0 = arith.constant 0 : index
    %c0_0 = arith.constant 0 : index
    %0 = vector.load %arg1[%c0, %c0_0] : memref<1x256xf32, #tpu.memory_space<vmem>>, vector<1x256xf32>
    %1 = vector.shape_cast %0 : vector<1x256xf32> to vector<1x256xf32>
    %2 = vector.broadcast %1 : vector<1x256xf32> to vector<2x256xf32>
    %c0_1 = arith.constant 0 : index
    %c0_2 = arith.constant 0 : index
    %3 = vector.load %arg2[%c0_1, %c0_2] : memref<2x256xf32, #tpu.memory_space<vmem>>, vector<2x256xf32>
    tpu.vector_store %arg2[%c0_1, %c0_2], %2 {strides = array<i32>} : memref<2x256xf32, #tpu.memory_space<vmem>>, vector<2x256xf32>,
    return
  }
  func.func @transform_0(%arg0: i32) -> (i32, i32) {
    %c0_i32 = arith.constant 0 : i32
    %c0_i32_0 = arith.constant 0 : i32
    return %c0_i32, %arg0 : i32, i32
  }
  func.func @transform_1(%arg0: i32) -> (i32, i32) {
    %c0_i32 = arith.constant 0 : i32
    %c0_i32_0 = arith.constant 0 : i32
    return %c0_i32, %arg0 : i32, i32
  }
}

</mosaic_0001>

<bundles_post_ra>
// kernel: tpu_custom_call.1
= control target key start
LH: loop header
LB: loop body
LE: loop exit
PB: predicated region body
PF: predicated region fallthrough
CT: control target
= control target key end

     0   :  { %6 = vsyncpa [#allocation3], 0  ;;  %s121_s0 = inlined_call_operand.hbm [shape: f32[1,256], index: 0, kind: input, shape index: {}]   ;;  %s122_s1 = inlined_call_operand.hbm [shape: f32[2,256], index: 1, kind: output, shape index: {}]  }
   0x1   :  { %7 = vsyncpa [#allocation4], 0  ;;  %s13_s8 = sshll.u32 %s121_s0, 4  ;;  %s103_s9 = smov [#allocation2]   ;;  %s14_s8 = int_to_ptr.hbm [resolvable:$true] %s13_s8 }
   0x2   :  { %s15_s10 = sshll.u32 %s103_s9, 4  ;;  %s16_s10 = int_to_ptr.vmem [resolvable:$true] %s15_s10 }
   0x3   :  { %18 = dma.hbm_to_vmem [thread:$0]  %s14_s8, 32, %s16_s10, [#allocation3]  }
   0x4   :  { %99 = dma.done.wait [#allocation3], 32  }
   0x5   :  { %100 = vsyncadd [#allocation3], 4294967264  ;;  %v23_v0 = vld [vmem:[#allocation2] sm:$0x3]  ;;  %s104_s11 = smov [#allocation5]   ;;  %s39_s15 = sshll.u32 %s122_s1, 4  ;;  %s40_s15 = int_to_ptr.hbm [resolvable:$true] %s39_s15 }
   0x6   :  { %v25_v1 = vperm.slane %v23_v0, 0  ;;  %v26_v2 = vperm.slane %v23_v0, 1  ;;  %s37_s12 = sshll.u32 %s104_s11, 4  ;;  %vm28_vm0 = vcmask 1041408   ;;  %s38_s12 = int_to_ptr.vmem [resolvable:$true] %s37_s12 }
   0x8   :  { %v27_v3 = vrot.slane %v26_v2, 6 }
   0xa   :  { %v29_v4 = vsel %vm28_vm0, %v25_v1, %v27_v3 }
   0xb   :  { %31 = vst [vmem:[#allocation5] sm:$0xf] %v29_v4 }
   0xc   :  { %42 = dma.vmem_to_hbm [thread:$0]  %s38_s12, 64, %s40_s15, [#allocation4]  }
   0xd   :  { %101 = dma.done.wait [#allocation4], 64  }
   0xe   :  { %102 = vsyncadd [#allocation4], 4294967232 }
   0xf   :  { %47 = vsyncpa [#allocation3], 1 }
  0x10   :  { %48 = vsyncpa [#allocation4], 1 }

</bundles_post_ra>
